<compile_context>
chip_gen: v5e
topology: v5e:2x2
jax: 0.10.0
libtpu: 0.0.40
codegen_flags: <defaults>
</compile_context>

<pallas_src>
import math
from functools import partial

import jax
import jax.numpy as jnp
from jax.experimental import pallas as pl
from jax.experimental.pallas import tpu as pltpu

D_MODEL = 10
D_MLP = 24
NUM_HEADS = 2
NUM_BLOCKS = 2
TEMPERATURE = 1.0
LN_EPS = 1e-6                                  # assumption for custom LayerNormalization
MAX_VEC_W = max(D_MODEL, D_MLP)                # 24  (padded width of the vector slab)
W_CAT_W = 3 * D_MODEL + D_MODEL + D_MLP        # 64  ([Wqkv' | Wo | W1])


# ---------------------------------------------------------------- kernel utils
def _ln(x, gamma, beta):
    mu = jnp.mean(x, axis=-1, keepdims=True)
    var = jnp.mean((x - mu) ** 2, axis=-1, keepdims=True)
    return gamma * (x - mu) * jax.lax.rsqrt(var + LN_EPS) + beta


# ---------------------------------------------------------------- fused kernel
def decoder_kernel(x_ref, wcat_ref, w2_ref, vec_ref, fln_ref, o_ref,
                   *, num_heads, temperature, num_blocks, d_model, d_mlp):
    """Whole decoder (all blocks + final LN) for one batch element, x kept in VMEM."""
    D = d_model
    dk = D // num_heads
    inv_scale = 1.0 / (math.sqrt(dk) * temperature)        # fused score scaling

    x = x_ref[0].astype(jnp.float32)                        # (S, D)

    # per-head full-width lane masks, hoisted out of the block loop
    col = jax.lax.broadcasted_iota(jnp.int32, (1, D), 1)
    masks = [((col >= h * dk) & (col < (h + 1) * dk)).astype(jnp.float32)
             for h in range(num_heads)]

    for blk in range(num_blocks):                           # static unroll over blocks
        wcat = wcat_ref[blk]                                # (D, 3D + D + D_MLP)
        w2 = w2_ref[blk]                                    # (D_MLP, D)
        vecs = vec_ref[blk]                                 # (6, MAX_VEC_W)
        g1, be1 = vecs[0:1, 0:D], vecs[1:2, 0:D]
        g2, be2 = vecs[2:3, 0:D], vecs[3:4, 0:D]
        b2 = vecs[4:5, 0:D]
        b1 = vecs[5:6, 0:d_mlp]

        # ---- residual 1: x + MHA(LN(x))  (pre-norm, dropout = identity) ----
        xn = _ln(x, g1, be1)
        # single fused QKV projection; H_Q already folded into the weights
        # (reference bug: H_Q used for Q, K and V - kept)
        qkv = jnp.dot(xn, wcat[:, 0:3 * D], preferred_element_type=jnp.float32)
        hq = qkv[:, 0:D]
        hk = qkv[:, D:2 * D]
        hv = qkv[:, 2 * D:3 * D]

        ctx = jnp.zeros_like(hq)
        for h in range(num_heads):                          # masked full-width heads
            m = masks[h]
            s = jnp.dot(hq * m, hk.T, preferred_element_type=jnp.float32) * inv_scale
            e = jnp.exp(s - jnp.max(s, axis=-1, keepdims=True))
            # TODO(synk): pl.reciprocal(approx=True) would run on the EUP slot; kept
            # exact to stay inside the 1e-4 parity tolerance of the reference check.
            w = e * pl.reciprocal(jnp.sum(e, axis=-1, keepdims=True), approx=False)
            ctx = ctx + jnp.dot(w, hv * m, preferred_element_type=jnp.float32)

        att = jnp.dot(ctx, wcat[:, 3 * D:4 * D], preferred_element_type=jnp.float32)
        x = x + att                                         # x1

        # ---- residual 2: x1 + MLP(LN(x1)) ----
        xn2 = _ln(x, g2, be2)
        h1 = jnp.maximum(
            jnp.dot(xn2, wcat[:, 4 * D:4 * D + d_mlp],
                    preferred_element_type=jnp.float32) + b1, 0.0)
        x = x + jnp.dot(h1, w2, preferred_element_type=jnp.float32) + b2

    # ---- final LayerNorm + single store ----
    o_ref[0] = _ln(x, fln_ref[0:1, :], fln_ref[1:2, :]).astype(o_ref.dtype)


# ---------------------------------------------------------------- wrappers
def _rep_spec(shape):
    # whole-array block (tiny packed params), replicated across the batch grid
    return pl.BlockSpec(shape, lambda b: (0,) * len(shape))


def pack_params(block_params, final_gamma, final_beta):
    """Fold H_Q into Q/K/V, concat weights, and stack everything per block."""
    wcat_list, w2_list, vec_list = [], [], []
    for p in block_params:
        wqkv = jnp.concatenate(
            [p["wq"] @ p["hq"], p["wk"] @ p["hq"], p["wv"] @ p["hq"]], axis=1)  # (D,3D)
        wcat_list.append(jnp.concatenate([wqkv, p["wo"], p["w1"]], axis=1))     # (D,64)
        w2_list.append(p["w2"])                                                 # (D_MLP,D)

        def pad(v):
            return jnp.pad(v, ((0, 0), (0, MAX_VEC_W - v.shape[1])))
        vec_list.append(jnp.concatenate(
            [pad(p["g1"]), pad(p["be1"]), pad(p["g2"]), pad(p["be2"]),
             pad(p["b2"]), pad(p["b1"])], axis=0))                              # (6,24)

    wcat = jnp.stack(wcat_list)                       # (NUM_BLOCKS, D, 64)
    w2 = jnp.stack(w2_list)                           # (NUM_BLOCKS, D_MLP, D)
    vecs = jnp.stack(vec_list)                        # (NUM_BLOCKS, 6, MAX_VEC_W)
    fln = jnp.concatenate([final_gamma, final_beta], axis=0)                    # (2, D)
    return wcat, w2, vecs, fln


def decoder_forward_pallas(x, packed):
    B, S, D = x.shape
    wcat, w2, vecs, fln = packed
    kern = partial(decoder_kernel, num_heads=NUM_HEADS, temperature=TEMPERATURE,
                   num_blocks=wcat.shape[0], d_model=D, d_mlp=w2.shape[1])
    return pl.pallas_call(
        kern,
        out_shape=jax.ShapeDtypeStruct((B, S, D), x.dtype),
        # 2-wide parallel batch axis: both v7x TensorCores get one batch element;
        # on v5e/v6e this is just a 2-step loop fully amortized by the fused body.
        grid=(B,),
        in_specs=[pl.BlockSpec((1, S, D), lambda b: (b, 0, 0)),
                  _rep_spec(wcat.shape), _rep_spec(w2.shape),
                  _rep_spec(vecs.shape), _rep_spec(fln.shape)],
        out_specs=pl.BlockSpec((1, S, D), lambda b: (b, 0, 0)),
        compiler_params=pltpu.CompilerParams(dimension_semantics=("parallel",)),
    )(x, wcat, w2, vecs, fln)


# ---------------------------------------------------------------- parameters
def _linear(key, fan_in, fan_out):
    bound = 1.0 / math.sqrt(fan_in)
    return jax.random.uniform(key, (fan_in, fan_out), jnp.float32, -bound, bound)


def init_params(key):
    blocks = []
    for _ in range(NUM_BLOCKS):
        keys = jax.random.split(key, 9)
        key = keys[-1]
        bound1 = 1.0 / math.sqrt(D_MODEL)
        bound2 = 1.0 / math.sqrt(D_MLP)
        blocks.append(dict(
            wq=_linear(keys[0], D_MODEL, D_MODEL),
            wk=_linear(keys[1], D_MODEL, D_MODEL),
            wv=_linear(keys[2], D_MODEL, D_MODEL),
            hq=_linear(keys[3], D_MODEL, D_MODEL),
            wo=_linear(keys[4], D_MODEL, D_MODEL),
            w1=_linear(keys[5], D_MODEL, D_MLP),
            b1=jax.random.uniform(keys[6], (1, D_MLP), jnp.float32, -bound1, bound1),
            w2=_linear(keys[7], D_MLP, D_MODEL),
            b2=jax.random.uniform(keys[8], (1, D_MODEL), jnp.float32, -bound2, bound2),
            g1=jnp.ones((1, D_MODEL), jnp.float32),
            be1=jnp.zeros((1, D_MODEL), jnp.float32),
            g2=jnp.ones((1, D_MODEL), jnp.float32),
            be2=jnp.zeros((1, D_MODEL), jnp.float32),
        ))
    final_gamma = jnp.ones((1, D_MODEL), jnp.float32)
    final_beta = jnp.zeros((1, D_MODEL), jnp.float32)
    return blocks, final_gamma, final_beta, key


# ---------------------------------------------------------------- pure-JAX reference
# (uses the ORIGINAL unpacked / unfolded weights -> validates H_Q folding, packing
#  and the masked-head formulation used inside the kernel)
def decoder_forward_ref(x, block_params, final_gamma, final_beta):
    B, S, D = x.shape
    H, dk = NUM_HEADS, D_MODEL // NUM_HEADS
    for p in block_params:
        xn = _ln(x, p["g1"], p["be1"])
        q, k, v = xn @ p["wq"], xn @ p["wk"], xn @ p["wv"]
        hq, hk, hv = q @ p["hq"], k @ p["hq"], v @ p["hq"]   # reference bug kept
        qh = hq.reshape(B, S, H, dk).transpose(0, 2, 1, 3)
        kh = hk.reshape(B, S, H, dk).transpose(0, 2, 1, 3)
        vh = hv.reshape(B, S, H, dk).transpose(0, 2, 1, 3)
        s = jnp.einsum("bhqd,bhkd->bhqk", qh, kh) / math.sqrt(dk) / TEMPERATURE
        w = jax.nn.softmax(s, axis=-1)
        ctx = jnp.einsum("bhqk,bhkd->bhqd", w, vh).transpose(0, 2, 1, 3).reshape(B, S, D)
        x1 = x + ctx @ p["wo"]
        xn2 = _ln(x1, p["g2"], p["be2"])
        mlp = jnp.maximum(xn2 @ p["w1"] + p["b1"], 0.0) @ p["w2"] + p["b2"]
        x = x1 + mlp
    return _ln(x, final_gamma, final_beta)


# ---------------------------------------------------------------- main
if __name__ == "__main__":
    B, S = 2, 8
    key = jax.random.PRNGKey(0)
    blocks, gF, bF, key = init_params(key)
    x = jax.random.normal(key, (B, S, D_MODEL), jnp.float32)

    packed = pack_params(blocks, gF, bF)
    out = decoder_forward_pallas(x, packed)
    out = jax.block_until_ready(out)

    ref = jax.block_until_ready(decoder_forward_ref(x, blocks, gF, bF))
    assert out.shape == (B, S, D_MODEL)
    if not jnp.allclose(out, ref, atol=1e-4, rtol=1e-4):
        raise AssertionError("Pallas output does not match JAX reference")
    print("KERNEL_OK")
</pallas_src>

<mosaic_0001>
module attributes {stable_mosaic.version = 11 : i64} {
  func.func @decoder_kernel(%arg0: i32, %arg1: memref<1x8x10xf32, #tpu.memory_space<vmem>>, %arg2: memref<2x10x64xf32, #tpu.memory_space<vmem>>, %arg3: memref<2x24x10xf32, #tpu.memory_space<vmem>>, %arg4: memref<2x6x24xf32, #tpu.memory_space<vmem>>, %arg5: memref<2x10xf32, #tpu.memory_space<vmem>>, %arg6: memref<1x8x10xf32, #tpu.memory_space<vmem>>) attributes {dimension_semantics = [#tpu.dimension_semantics<parallel>], iteration_bounds = array<i64: 2>, scalar_prefetch = 0 : i64, scratch_operands = 0 : i64, tpu.core_type = #tpu.core_type<tc>, window_params = [{transform_indices = @transform_0, window_bounds = array<i64: 1, 8, 10>}, {pipeline_mode = #tpu.pipeline_mode<synchronous>, transform_indices = @transform_1, window_bounds = array<i64: 2, 10, 64>}, {pipeline_mode = #tpu.pipeline_mode<synchronous>, transform_indices = @transform_2, window_bounds = array<i64: 2, 24, 10>}, {pipeline_mode = #tpu.pipeline_mode<synchronous>, transform_indices = @transform_3, window_bounds = array<i64: 2, 6, 24>}, {pipeline_mode = #tpu.pipeline_mode<synchronous>, transform_indices = @transform_4, window_bounds = array<i64: 2, 10>}, {transform_indices = @transform_5, window_bounds = array<i64: 1, 8, 10>}]} {
    %c0 = arith.constant 0 : index
    %c0_0 = arith.constant 0 : index
    %c0_1 = arith.constant 0 : index
    %0 = vector.load %arg1[%c0, %c0_0, %c0_1] : memref<1x8x10xf32, #tpu.memory_space<vmem>>, vector<1x8x10xf32>
    %1 = vector.shape_cast %0 : vector<1x8x10xf32> to vector<8x10xf32>
    %2 = tpu.iota {dimensions = array<i32: 1>} : vector<1x10xi32>
    %c0_i32 = arith.constant 0 : i32
    %3 = vector.broadcast %c0_i32 : i32 to vector<1x10xi32>
    %4 = arith.cmpi sge, %2, %3 : vector<1x10xi32>
    %c5_i32 = arith.constant 5 : i32
    %5 = vector.broadcast %c5_i32 : i32 to vector<1x10xi32>
    %6 = arith.cmpi slt, %2, %5 : vector<1x10xi32>
    %7 = arith.andi %4, %6 : vector<1x10xi1>
    %8 = arith.extui %7 : vector<1x10xi1> to vector<1x10xi32>
    %9 = arith.sitofp %8 : vector<1x10xi32> to vector<1x10xf32>
    %c5_i32_2 = arith.constant 5 : i32
    %10 = vector.broadcast %c5_i32_2 : i32 to vector<1x10xi32>
    %11 = arith.cmpi sge, %2, %10 : vector<1x10xi32>
    %c10_i32 = arith.constant 10 : i32
    %12 = vector.broadcast %c10_i32 : i32 to vector<1x10xi32>
    %13 = arith.cmpi slt, %2, %12 : vector<1x10xi32>
    %14 = arith.andi %11, %13 : vector<1x10xi1>
    %15 = arith.extui %14 : vector<1x10xi1> to vector<1x10xi32>
    %16 = arith.sitofp %15 : vector<1x10xi32> to vector<1x10xf32>
    %c0_3 = arith.constant 0 : index
    %c0_4 = arith.constant 0 : index
    %c0_5 = arith.constant 0 : index
    %17 = vector.load %arg2[%c0_3, %c0_4, %c0_5] : memref<2x10x64xf32, #tpu.memory_space<vmem>>, vector<1x10x64xf32>
    %18 = vector.shape_cast %17 : vector<1x10x64xf32> to vector<10x64xf32>
    %c0_6 = arith.constant 0 : index
    %c0_7 = arith.constant 0 : index
    %c0_8 = arith.constant 0 : index
    %19 = vector.load %arg3[%c0_6, %c0_7, %c0_8] : memref<2x24x10xf32, #tpu.memory_space<vmem>>, vector<1x24x10xf32>
    %20 = vector.shape_cast %19 : vector<1x24x10xf32> to vector<24x10xf32>
    %c0_9 = arith.constant 0 : index
    %c0_10 = arith.constant 0 : index
    %c0_11 = arith.constant 0 : index
    %21 = vector.load %arg4[%c0_9, %c0_10, %c0_11] : memref<2x6x24xf32, #tpu.memory_space<vmem>>, vector<1x6x24xf32>
    %22 = vector.shape_cast %21 : vector<1x6x24xf32> to vector<6x24xf32>
    %23 = vector.extract_strided_slice %22 {offsets = [0, 0], sizes = [1, 10], strides = [1, 1]} : vector<6x24xf32> to vector<1x10xf32>
    %24 = vector.extract_strided_slice %22 {offsets = [1, 0], sizes = [1, 10], strides = [1, 1]} : vector<6x24xf32> to vector<1x10xf32>
    %25 = vector.extract_strided_slice %22 {offsets = [2, 0], sizes = [1, 10], strides = [1, 1]} : vector<6x24xf32> to vector<1x10xf32>
    %26 = vector.extract_strided_slice %22 {offsets = [3, 0], sizes = [1, 10], strides = [1, 1]} : vector<6x24xf32> to vector<1x10xf32>
    %27 = vector.extract_strided_slice %22 {offsets = [4, 0], sizes = [1, 10], strides = [1, 1]} : vector<6x24xf32> to vector<1x10xf32>
    %28 = vector.extract_strided_slice %22 {offsets = [5, 0], sizes = [1, 24], strides = [1, 1]} : vector<6x24xf32> to vector<1x24xf32>
    %cst = arith.constant dense<0.000000e+00> : vector<8xf32>
    %29 = vector.multi_reduction <add>, %1, %cst [1] : vector<8x10xf32> to vector<8xf32>
    %30 = vector.shape_cast %29 : vector<8xf32> to vector<8x1xf32>
    %cst_12 = arith.constant 1.000000e+01 : f32
    %31 = vector.broadcast %cst_12 : f32 to vector<8x1xf32>
    %32 = arith.divf %30, %31 : vector<8x1xf32>
    %33 = vector.broadcast %32 : vector<8x1xf32> to vector<8x10xf32>
    %34 = arith.subf %1, %33 : vector<8x10xf32>
    %35 = arith.mulf %34, %34 : vector<8x10xf32>
    %cst_13 = arith.constant dense<0.000000e+00> : vector<8xf32>
    %36 = vector.multi_reduction <add>, %35, %cst_13 [1] : vector<8x10xf32> to vector<8xf32>
    %37 = vector.shape_cast %36 : vector<8xf32> to vector<8x1xf32>
    %cst_14 = arith.constant 1.000000e+01 : f32
    %38 = vector.broadcast %cst_14 : f32 to vector<8x1xf32>
    %39 = arith.divf %37, %38 : vector<8x1xf32>
    %40 = vector.broadcast %32 : vector<8x1xf32> to vector<8x10xf32>
    %41 = arith.subf %1, %40 : vector<8x10xf32>
    %42 = vector.broadcast %23 : vector<1x10xf32> to vector<8x10xf32>
    %43 = arith.mulf %42, %41 : vector<8x10xf32>
    %cst_15 = arith.constant 9.99999997E-7 : f32
    %44 = vector.broadcast %cst_15 : f32 to vector<8x1xf32>
    %45 = arith.addf %39, %44 : vector<8x1xf32>
    %46 = math.rsqrt %45 : vector<8x1xf32>
    %47 = vector.broadcast %46 : vector<8x1xf32> to vector<8x10xf32>
    %48 = arith.mulf %43, %47 : vector<8x10xf32>
    %49 = vector.broadcast %24 : vector<1x10xf32> to vector<8x10xf32>
    %50 = arith.addf %48, %49 : vector<8x10xf32>
    %51 = vector.extract_strided_slice %18 {offsets = [0, 0], sizes = [10, 30], strides = [1, 1]} : vector<10x64xf32> to vector<10x30xf32>
    %cst_16 = arith.constant dense<0.000000e+00> : vector<8x30xf32>
    %52 = tpu.matmul %50, %51, %cst_16 {dimension_numbers = #tpu.dot_dimension_numbers<[1], [0], [0], [1], [0, 0, 1, 1], [], []>} : vector<8x10xf32>, vector<10x30xf32>, vector<8x30xf32> -> vector<8x30xf32>
    %53 = vector.extract_strided_slice %52 {offsets = [0, 0], sizes = [8, 10], strides = [1, 1]} : vector<8x30xf32> to vector<8x10xf32>
    %54 = vector.extract_strided_slice %52 {offsets = [0, 10], sizes = [8, 10], strides = [1, 1]} : vector<8x30xf32> to vector<8x10xf32>
    %55 = vector.extract_strided_slice %52 {offsets = [0, 20], sizes = [8, 10], strides = [1, 1]} : vector<8x30xf32> to vector<8x10xf32>
    %cst_17 = arith.constant 0.000000e+00 : f32
    %56 = vector.broadcast %cst_17 : f32 to vector<8x10xf32>
    %57 = vector.broadcast %9 : vector<1x10xf32> to vector<8x10xf32>
    %58 = arith.mulf %53, %57 : vector<8x10xf32>
    %59 = tpu.transpose %54, [1, 0] : vector<8x10xf32> -> vector<10x8xf32>
    %cst_18 = arith.constant dense<0.000000e+00> : vector<8x8xf32>
    %60 = tpu.matmul %58, %59, %cst_18 {dimension_numbers = #tpu.dot_dimension_numbers<[1], [0], [0], [1], [0, 0, 1, 1], [], []>} : vector<8x10xf32>, vector<10x8xf32>, vector<8x8xf32> -> vector<8x8xf32>
    %cst_19 = arith.constant 0.44721359 : f32
    %61 = vector.broadcast %cst_19 : f32 to vector<8x8xf32>
    %62 = arith.mulf %60, %61 : vector<8x8xf32>
    %cst_20 = arith.constant dense<0xFF800000> : vector<8xf32>
    %63 = vector.multi_reduction <maximumf>, %62, %cst_20 [1] : vector<8x8xf32> to vector<8xf32>
    %64 = vector.shape_cast %63 : vector<8xf32> to vector<8x1xf32>
    %65 = vector.broadcast %64 : vector<8x1xf32> to vector<8x8xf32>
    %66 = arith.subf %62, %65 : vector<8x8xf32>
    %67 = math.exp %66 : vector<8x8xf32>
    %cst_21 = arith.constant dense<0.000000e+00> : vector<8xf32>
    %68 = vector.multi_reduction <add>, %67, %cst_21 [1] : vector<8x8xf32> to vector<8xf32>
    %69 = vector.shape_cast %68 : vector<8xf32> to vector<8x1xf32>
    %70 = tpu.reciprocal %69 : vector<8x1xf32> -> vector<8x1xf32>
    %71 = vector.broadcast %70 : vector<8x1xf32> to vector<8x8xf32>
    %72 = arith.mulf %67, %71 : vector<8x8xf32>
    %73 = vector.broadcast %9 : vector<1x10xf32> to vector<8x10xf32>
    %74 = arith.mulf %55, %73 : vector<8x10xf32>
    %cst_22 = arith.constant dense<0.000000e+00> : vector<8x10xf32>
    %75 = tpu.matmul %72, %74, %cst_22 {dimension_numbers = #tpu.dot_dimension_numbers<[1], [0], [0], [1], [0, 0, 1, 1], [], []>} : vector<8x8xf32>, vector<8x10xf32>, vector<8x10xf32> -> vector<8x10xf32>
    %76 = arith.addf %56, %75 : vector<8x10xf32>
    %77 = vector.broadcast %16 : vector<1x10xf32> to vector<8x10xf32>
    %78 = arith.mulf %53, %77 : vector<8x10xf32>
    %79 = tpu.transpose %54, [1, 0] : vector<8x10xf32> -> vector<10x8xf32>
    %cst_23 = arith.constant dense<0.000000e+00> : vector<8x8xf32>
    %80 = tpu.matmul %78, %79, %cst_23 {dimension_numbers = #tpu.dot_dimension_numbers<[1], [0], [0], [1], [0, 0, 1, 1], [], []>} : vector<8x10xf32>, vector<10x8xf32>, vector<8x8xf32> -> vector<8x8xf32>
    %cst_24 = arith.constant 0.44721359 : f32
    %81 = vector.broadcast %cst_24 : f32 to vector<8x8xf32>
    %82 = arith.mulf %80, %81 : vector<8x8xf32>
    %cst_25 = arith.constant dense<0xFF800000> : vector<8xf32>
    %83 = vector.multi_reduction <maximumf>, %82, %cst_25 [1] : vector<8x8xf32> to vector<8xf32>
    %84 = vector.shape_cast %83 : vector<8xf32> to vector<8x1xf32>
    %85 = vector.broadcast %84 : vector<8x1xf32> to vector<8x8xf32>
    %86 = arith.subf %82, %85 : vector<8x8xf32>
    %87 = math.exp %86 : vector<8x8xf32>
    %cst_26 = arith.constant dense<0.000000e+00> : vector<8xf32>
    %88 = vector.multi_reduction <add>, %87, %cst_26 [1] : vector<8x8xf32> to vector<8xf32>
    %89 = vector.shape_cast %88 : vector<8xf32> to vector<8x1xf32>
    %90 = tpu.reciprocal %89 : vector<8x1xf32> -> vector<8x1xf32>
    %91 = vector.broadcast %90 : vector<8x1xf32> to vector<8x8xf32>
    %92 = arith.mulf %87, %91 : vector<8x8xf32>
    %93 = vector.broadcast %16 : vector<1x10xf32> to vector<8x10xf32>
    %94 = arith.mulf %55, %93 : vector<8x10xf32>
    %cst_27 = arith.constant dense<0.000000e+00> : vector<8x10xf32>
    %95 = tpu.matmul %92, %94, %cst_27 {dimension_numbers = #tpu.dot_dimension_numbers<[1], [0], [0], [1], [0, 0, 1, 1], [], []>} : vector<8x8xf32>, vector<8x10xf32>, vector<8x10xf32> -> vector<8x10xf32>
    %96 = arith.addf %76, %95 : vector<8x10xf32>
    %97 = vector.extract_strided_slice %18 {offsets = [0, 30], sizes = [10, 10], strides = [1, 1]} : vector<10x64xf32> to vector<10x10xf32>
    %cst_28 = arith.constant dense<0.000000e+00> : vector<8x10xf32>
    %98 = tpu.matmul %96, %97, %cst_28 {dimension_numbers = #tpu.dot_dimension_numbers<[1], [0], [0], [1], [0, 0, 1, 1], [], []>} : vector<8x10xf32>, vector<10x10xf32>, vector<8x10xf32> -> vector<8x10xf32>
    %99 = arith.addf %1, %98 : vector<8x10xf32>
    %cst_29 = arith.constant dense<0.000000e+00> : vector<8xf32>
    %100 = vector.multi_reduction <add>, %99, %cst_29 [1] : vector<8x10xf32> to vector<8xf32>
    %101 = vector.shape_cast %100 : vector<8xf32> to vector<8x1xf32>
    %cst_30 = arith.constant 1.000000e+01 : f32
    %102 = vector.broadcast %cst_30 : f32 to vector<8x1xf32>
    %103 = arith.divf %101, %102 : vector<8x1xf32>
    %104 = vector.broadcast %103 : vector<8x1xf32> to vector<8x10xf32>
    %105 = arith.subf %99, %104 : vector<8x10xf32>
    %106 = arith.mulf %105, %105 : vector<8x10xf32>
    %cst_31 = arith.constant dense<0.000000e+00> : vector<8xf32>
    %107 = vector.multi_reduction <add>, %106, %cst_31 [1] : vector<8x10xf32> to vector<8xf32>
    %108 = vector.shape_cast %107 : vector<8xf32> to vector<8x1xf32>
    %cst_32 = arith.constant 1.000000e+01 : f32
    %109 = vector.broadcast %cst_32 : f32 to vector<8x1xf32>
    %110 = arith.divf %108, %109 : vector<8x1xf32>
    %111 = vector.broadcast %103 : vector<8x1xf32> to vector<8x10xf32>
    %112 = arith.subf %99, %111 : vector<8x10xf32>
    %113 = vector.broadcast %25 : vector<1x10xf32> to vector<8x10xf32>
    %114 = arith.mulf %113, %112 : vector<8x10xf32>
    %cst_33 = arith.constant 9.99999997E-7 : f32
    %115 = vector.broadcast %cst_33 : f32 to vector<8x1xf32>
    %116 = arith.addf %110, %115 : vector<8x1xf32>
    %117 = math.rsqrt %116 : vector<8x1xf32>
    %118 = vector.broadcast %117 : vector<8x1xf32> to vector<8x10xf32>
    %119 = arith.mulf %114, %118 : vector<8x10xf32>
    %120 = vector.broadcast %26 : vector<1x10xf32> to vector<8x10xf32>
    %121 = arith.addf %119, %120 : vector<8x10xf32>
    %122 = vector.extract_strided_slice %18 {offsets = [0, 40], sizes = [10, 24], strides = [1, 1]} : vector<10x64xf32> to vector<10x24xf32>
    %cst_34 = arith.constant dense<0.000000e+00> : vector<8x24xf32>
    %123 = tpu.matmul %121, %122, %cst_34 {dimension_numbers = #tpu.dot_dimension_numbers<[1], [0], [0], [1], [0, 0, 1, 1], [], []>} : vector<8x10xf32>, vector<10x24xf32>, vector<8x24xf32> -> vector<8x24xf32>
    %124 = vector.broadcast %28 : vector<1x24xf32> to vector<8x24xf32>
    %125 = arith.addf %123, %124 : vector<8x24xf32>
    %cst_35 = arith.constant 0.000000e+00 : f32
    %126 = vector.broadcast %cst_35 : f32 to vector<8x24xf32>
    %127 = arith.maximumf %125, %126 : vector<8x24xf32>
    %cst_36 = arith.constant dense<0.000000e+00> : vector<8x10xf32>
    %128 = tpu.matmul %127, %20, %cst_36 {dimension_numbers = #tpu.dot_dimension_numbers<[1], [0], [0], [1], [0, 0, 1, 1], [], []>} : vector<8x24xf32>, vector<24x10xf32>, vector<8x10xf32> -> vector<8x10xf32>
    %129 = arith.addf %99, %128 : vector<8x10xf32>
    %130 = vector.broadcast %27 : vector<1x10xf32> to vector<8x10xf32>
    %131 = arith.addf %129, %130 : vector<8x10xf32>
    %c1 = arith.constant 1 : index
    %c0_37 = arith.constant 0 : index
    %c0_38 = arith.constant 0 : index
    %132 = vector.load %arg2[%c1, %c0_37, %c0_38] : memref<2x10x64xf32, #tpu.memory_space<vmem>>, vector<1x10x64xf32>
    %133 = vector.shape_cast %132 : vector<1x10x64xf32> to vector<10x64xf32>
    %c1_39 = arith.constant 1 : index
    %c0_40 = arith.constant 0 : index
    %c0_41 = arith.constant 0 : index
    %134 = vector.load %arg3[%c1_39, %c0_40, %c0_41] : memref<2x24x10xf32, #tpu.memory_space<vmem>>, vector<1x24x10xf32>
    %135 = vector.shape_cast %134 : vector<1x24x10xf32> to vector<24x10xf32>
    %c1_42 = arith.constant 1 : index
    %c0_43 = arith.constant 0 : index
    %c0_44 = arith.constant 0 : index
    %136 = vector.load %arg4[%c1_42, %c0_43, %c0_44] : memref<2x6x24xf32, #tpu.memory_space<vmem>>, vector<1x6x24xf32>
    %137 = vector.shape_cast %136 : vector<1x6x24xf32> to vector<6x24xf32>
    %138 = vector.extract_strided_slice %137 {offsets = [0, 0], sizes = [1, 10], strides = [1, 1]} : vector<6x24xf32> to vector<1x10xf32>
    %139 = vector.extract_strided_slice %137 {offsets = [1, 0], sizes = [1, 10], strides = [1, 1]} : vector<6x24xf32> to vector<1x10xf32>
    %140 = vector.extract_strided_slice %137 {offsets = [2, 0], sizes = [1, 10], strides = [1, 1]} : vector<6x24xf32> to vector<1x10xf32>
    %141 = vector.extract_strided_slice %137 {offsets = [3, 0], sizes = [1, 10], strides = [1, 1]} : vector<6x24xf32> to vector<1x10xf32>
    %142 = vector.extract_strided_slice %137 {offsets = [4, 0], sizes = [1, 10], strides = [1, 1]} : vector<6x24xf32> to vector<1x10xf32>
    %143 = vector.extract_strided_slice %137 {offsets = [5, 0], sizes = [1, 24], strides = [1, 1]} : vector<6x24xf32> to vector<1x24xf32>
    %cst_45 = arith.constant dense<0.000000e+00> : vector<8xf32>
    %144 = vector.multi_reduction <add>, %131, %cst_45 [1] : vector<8x10xf32> to vector<8xf32>
    %145 = vector.shape_cast %144 : vector<8xf32> to vector<8x1xf32>
    %cst_46 = arith.constant 1.000000e+01 : f32
    %146 = vector.broadcast %cst_46 : f32 to vector<8x1xf32>
    %147 = arith.divf %145, %146 : vector<8x1xf32>
    %148 = vector.broadcast %147 : vector<8x1xf32> to vector<8x10xf32>
    %149 = arith.subf %131, %148 : vector<8x10xf32>
    %150 = arith.mulf %149, %149 : vector<8x10xf32>
    %cst_47 = arith.constant dense<0.000000e+00> : vector<8xf32>
    %151 = vector.multi_reduction <add>, %150, %cst_47 [1] : vector<8x10xf32> to vector<8xf32>
    %152 = vector.shape_cast %151 : vector<8xf32> to vector<8x1xf32>
    %cst_48 = arith.constant 1.000000e+01 : f32
    %153 = vector.broadcast %cst_48 : f32 to vector<8x1xf32>
    %154 = arith.divf %152, %153 : vector<8x1xf32>
    %155 = vector.broadcast %147 : vector<8x1xf32> to vector<8x10xf32>
    %156 = arith.subf %131, %155 : vector<8x10xf32>
    %157 = vector.broadcast %138 : vector<1x10xf32> to vector<8x10xf32>
    %158 = arith.mulf %157, %156 : vector<8x10xf32>
    %cst_49 = arith.constant 9.99999997E-7 : f32
    %159 = vector.broadcast %cst_49 : f32 to vector<8x1xf32>
    %160 = arith.addf %154, %159 : vector<8x1xf32>
    %161 = math.rsqrt %160 : vector<8x1xf32>
    %162 = vector.broadcast %161 : vector<8x1xf32> to vector<8x10xf32>
    %163 = arith.mulf %158, %162 : vector<8x10xf32>
    %164 = vector.broadcast %139 : vector<1x10xf32> to vector<8x10xf32>
    %165 = arith.addf %163, %164 : vector<8x10xf32>
    %166 = vector.extract_strided_slice %133 {offsets = [0, 0], sizes = [10, 30], strides = [1, 1]} : vector<10x64xf32> to vector<10x30xf32>
    %cst_50 = arith.constant dense<0.000000e+00> : vector<8x30xf32>
    %167 = tpu.matmul %165, %166, %cst_50 {dimension_numbers = #tpu.dot_dimension_numbers<[1], [0], [0], [1], [0, 0, 1, 1], [], []>} : vector<8x10xf32>, vector<10x30xf32>, vector<8x30xf32> -> vector<8x30xf32>
    %168 = vector.extract_strided_slice %167 {offsets = [0, 0], sizes = [8, 10], strides = [1, 1]} : vector<8x30xf32> to vector<8x10xf32>
    %169 = vector.extract_strided_slice %167 {offsets = [0, 10], sizes = [8, 10], strides = [1, 1]} : vector<8x30xf32> to vector<8x10xf32>
    %170 = vector.extract_strided_slice %167 {offsets = [0, 20], sizes = [8, 10], strides = [1, 1]} : vector<8x30xf32> to vector<8x10xf32>
    %cst_51 = arith.constant 0.000000e+00 : f32
    %171 = vector.broadcast %cst_51 : f32 to vector<8x10xf32>
    %172 = vector.broadcast %9 : vector<1x10xf32> to vector<8x10xf32>
    %173 = arith.mulf %168, %172 : vector<8x10xf32>
    %174 = tpu.transpose %169, [1, 0] : vector<8x10xf32> -> vector<10x8xf32>
    %cst_52 = arith.constant dense<0.000000e+00> : vector<8x8xf32>
    %175 = tpu.matmul %173, %174, %cst_52 {dimension_numbers = #tpu.dot_dimension_numbers<[1], [0], [0], [1], [0, 0, 1, 1], [], []>} : vector<8x10xf32>, vector<10x8xf32>, vector<8x8xf32> -> vector<8x8xf32>
    %cst_53 = arith.constant 0.44721359 : f32
    %176 = vector.broadcast %cst_53 : f32 to vector<8x8xf32>
    %177 = arith.mulf %175, %176 : vector<8x8xf32>
    %cst_54 = arith.constant dense<0xFF800000> : vector<8xf32>
    %178 = vector.multi_reduction <maximumf>, %177, %cst_54 [1] : vector<8x8xf32> to vector<8xf32>
    %179 = vector.shape_cast %178 : vector<8xf32> to vector<8x1xf32>
    %180 = vector.broadcast %179 : vector<8x1xf32> to vector<8x8xf32>
    %181 = arith.subf %177, %180 : vector<8x8xf32>
    %182 = math.exp %181 : vector<8x8xf32>
    %cst_55 = arith.constant dense<0.000000e+00> : vector<8xf32>
    %183 = vector.multi_reduction <add>, %182, %cst_55 [1] : vector<8x8xf32> to vector<8xf32>
    %184 = vector.shape_cast %183 : vector<8xf32> to vector<8x1xf32>
    %185 = tpu.reciprocal %184 : vector<8x1xf32> -> vector<8x1xf32>
    %186 = vector.broadcast %185 : vector<8x1xf32> to vector<8x8xf32>
    %187 = arith.mulf %182, %186 : vector<8x8xf32>
    %188 = vector.broadcast %9 : vector<1x10xf32> to vector<8x10xf32>
    %189 = arith.mulf %170, %188 : vector<8x10xf32>
    %cst_56 = arith.constant dense<0.000000e+00> : vector<8x10xf32>
    %190 = tpu.matmul %187, %189, %cst_56 {dimension_numbers = #tpu.dot_dimension_numbers<[1], [0], [0], [1], [0, 0, 1, 1], [], []>} : vector<8x8xf32>, vector<8x10xf32>, vector<8x10xf32> -> vector<8x10xf32>
    %191 = arith.addf %171, %190 : vector<8x10xf32>
    %192 = vector.broadcast %16 : vector<1x10xf32> to vector<8x10xf32>
    %193 = arith.mulf %168, %192 : vector<8x10xf32>
    %194 = tpu.transpose %169, [1, 0] : vector<8x10xf32> -> vector<10x8xf32>
    %cst_57 = arith.constant dense<0.000000e+00> : vector<8x8xf32>
    %195 = tpu.matmul %193, %194, %cst_57 {dimension_numbers = #tpu.dot_dimension_numbers<[1], [0], [0], [1], [0, 0, 1, 1], [], []>} : vector<8x10xf32>, vector<10x8xf32>, vector<8x8xf32> -> vector<8x8xf32>
    %cst_58 = arith.constant 0.44721359 : f32
    %196 = vector.broadcast %cst_58 : f32 to vector<8x8xf32>
    %197 = arith.mulf %195, %196 : vector<8x8xf32>
    %cst_59 = arith.constant dense<0xFF800000> : vector<8xf32>
    %198 = vector.multi_reduction <maximumf>, %197, %cst_59 [1] : vector<8x8xf32> to vector<8xf32>
    %199 = vector.shape_cast %198 : vector<8xf32> to vector<8x1xf32>
    %200 = vector.broadcast %199 : vector<8x1xf32> to vector<8x8xf32>
    %201 = arith.subf %197, %200 : vector<8x8xf32>
    %202 = math.exp %201 : vector<8x8xf32>
    %cst_60 = arith.constant dense<0.000000e+00> : vector<8xf32>
    %203 = vector.multi_reduction <add>, %202, %cst_60 [1] : vector<8x8xf32> to vector<8xf32>
    %204 = vector.shape_cast %203 : vector<8xf32> to vector<8x1xf32>
    %205 = tpu.reciprocal %204 : vector<8x1xf32> -> vector<8x1xf32>
    %206 = vector.broadcast %205 : vector<8x1xf32> to vector<8x8xf32>
    %207 = arith.mulf %202, %206 : vector<8x8xf32>
    %208 = vector.broadcast %16 : vector<1x10xf32> to vector<8x10xf32>
    %209 = arith.mulf %170, %208 : vector<8x10xf32>
    %cst_61 = arith.constant dense<0.000000e+00> : vector<8x10xf32>
    %210 = tpu.matmul %207, %209, %cst_61 {dimension_numbers = #tpu.dot_dimension_numbers<[1], [0], [0], [1], [0, 0, 1, 1], [], []>} : vector<8x8xf32>, vector<8x10xf32>, vector<8x10xf32> -> vector<8x10xf32>
    %211 = arith.addf %191, %210 : vector<8x10xf32>
    %212 = vector.extract_strided_slice %133 {offsets = [0, 30], sizes = [10, 10], strides = [1, 1]} : vector<10x64xf32> to vector<10x10xf32>
    %cst_62 = arith.constant dense<0.000000e+00> : vector<8x10xf32>
    %213 = tpu.matmul %211, %212, %cst_62 {dimension_numbers = #tpu.dot_dimension_numbers<[1], [0], [0], [1], [0, 0, 1, 1], [], []>} : vector<8x10xf32>, vector<10x10xf32>, vector<8x10xf32> -> vector<8x10xf32>
    %214 = arith.addf %131, %213 : vector<8x10xf32>
    %cst_63 = arith.constant dense<0.000000e+00> : vector<8xf32>
    %215 = vector.multi_reduction <add>, %214, %cst_63 [1] : vector<8x10xf32> to vector<8xf32>
    %216 = vector.shape_cast %215 : vector<8xf32> to vector<8x1xf32>
    %cst_64 = arith.constant 1.000000e+01 : f32
    %217 = vector.broadcast %cst_64 : f32 to vector<8x1xf32>
    %218 = arith.divf %216, %217 : vector<8x1xf32>
    %219 = vector.broadcast %218 : vector<8x1xf32> to vector<8x10xf32>
    %220 = arith.subf %214, %219 : vector<8x10xf32>
    %221 = arith.mulf %220, %220 : vector<8x10xf32>
    %cst_65 = arith.constant dense<0.000000e+00> : vector<8xf32>
    %222 = vector.multi_reduction <add>, %221, %cst_65 [1] : vector<8x10xf32> to vector<8xf32>
    %223 = vector.shape_cast %222 : vector<8xf32> to vector<8x1xf32>
    %cst_66 = arith.constant 1.000000e+01 : f32
    %224 = vector.broadcast %cst_66 : f32 to vector<8x1xf32>
    %225 = arith.divf %223, %224 : vector<8x1xf32>
    %226 = vector.broadcast %218 : vector<8x1xf32> to vector<8x10xf32>
    %227 = arith.subf %214, %226 : vector<8x10xf32>
    %228 = vector.broadcast %140 : vector<1x10xf32> to vector<8x10xf32>
    %229 = arith.mulf %228, %227 : vector<8x10xf32>
    %cst_67 = arith.constant 9.99999997E-7 : f32
    %230 = vector.broadcast %cst_67 : f32 to vector<8x1xf32>
    %231 = arith.addf %225, %230 : vector<8x1xf32>
    %232 = math.rsqrt %231 : vector<8x1xf32>
    %233 = vector.broadcast %232 : vector<8x1xf32> to vector<8x10xf32>
    %234 = arith.mulf %229, %233 : vector<8x10xf32>
    %235 = vector.broadcast %141 : vector<1x10xf32> to vector<8x10xf32>
    %236 = arith.addf %234, %235 : vector<8x10xf32>
    %237 = vector.extract_strided_slice %133 {offsets = [0, 40], sizes = [10, 24], strides = [1, 1]} : vector<10x64xf32> to vector<10x24xf32>
    %cst_68 = arith.constant dense<0.000000e+00> : vector<8x24xf32>
    %238 = tpu.matmul %236, %237, %cst_68 {dimension_numbers = #tpu.dot_dimension_numbers<[1], [0], [0], [1], [0, 0, 1, 1], [], []>} : vector<8x10xf32>, vector<10x24xf32>, vector<8x24xf32> -> vector<8x24xf32>
    %239 = vector.broadcast %143 : vector<1x24xf32> to vector<8x24xf32>
    %240 = arith.addf %238, %239 : vector<8x24xf32>
    %cst_69 = arith.constant 0.000000e+00 : f32
    %241 = vector.broadcast %cst_69 : f32 to vector<8x24xf32>
    %242 = arith.maximumf %240, %241 : vector<8x24xf32>
    %cst_70 = arith.constant dense<0.000000e+00> : vector<8x10xf32>
    %243 = tpu.matmul %242, %135, %cst_70 {dimension_numbers = #tpu.dot_dimension_numbers<[1], [0], [0], [1], [0, 0, 1, 1], [], []>} : vector<8x24xf32>, vector<24x10xf32>, vector<8x10xf32> -> vector<8x10xf32>
    %244 = arith.addf %214, %243 : vector<8x10xf32>
    %245 = vector.broadcast %142 : vector<1x10xf32> to vector<8x10xf32>
    %246 = arith.addf %244, %245 : vector<8x10xf32>
    %c0_71 = arith.constant 0 : index
    %c0_72 = arith.constant 0 : index
    %247 = vector.load %arg5[%c0_71, %c0_72] : memref<2x10xf32, #tpu.memory_space<vmem>>, vector<1x10xf32>
    %c1_73 = arith.constant 1 : index
    %c0_74 = arith.constant 0 : index
    %248 = vector.load %arg5[%c1_73, %c0_74] : memref<2x10xf32, #tpu.memory_space<vmem>>, vector<1x10xf32>
    %cst_75 = arith.constant dense<0.000000e+00> : vector<8xf32>
    %249 = vector.multi_reduction <add>, %246, %cst_75 [1] : vector<8x10xf32> to vector<8xf32>
    %250 = vector.shape_cast %249 : vector<8xf32> to vector<8x1xf32>
    %cst_76 = arith.constant 1.000000e+01 : f32
    %251 = vector.broadcast %cst_76 : f32 to vector<8x1xf32>
    %252 = arith.divf %250, %251 : vector<8x1xf32>
    %253 = vector.broadcast %252 : vector<8x1xf32> to vector<8x10xf32>
    %254 = arith.subf %246, %253 : vector<8x10xf32>
    %255 = arith.mulf %254, %254 : vector<8x10xf32>
    %cst_77 = arith.constant dense<0.000000e+00> : vector<8xf32>
    %256 = vector.multi_reduction <add>, %255, %cst_77 [1] : vector<8x10xf32> to vector<8xf32>
    %257 = vector.shape_cast %256 : vector<8xf32> to vector<8x1xf32>
    %cst_78 = arith.constant 1.000000e+01 : f32
    %258 = vector.broadcast %cst_78 : f32 to vector<8x1xf32>
    %259 = arith.divf %257, %258 : vector<8x1xf32>
    %260 = vector.broadcast %252 : vector<8x1xf32> to vector<8x10xf32>
    %261 = arith.subf %246, %260 : vector<8x10xf32>
    %262 = vector.broadcast %247 : vector<1x10xf32> to vector<8x10xf32>
    %263 = arith.mulf %262, %261 : vector<8x10xf32>
    %cst_79 = arith.constant 9.99999997E-7 : f32
    %264 = vector.broadcast %cst_79 : f32 to vector<8x1xf32>
    %265 = arith.addf %259, %264 : vector<8x1xf32>
    %266 = math.rsqrt %265 : vector<8x1xf32>
    %267 = vector.broadcast %266 : vector<8x1xf32> to vector<8x10xf32>
    %268 = arith.mulf %263, %267 : vector<8x10xf32>
    %269 = vector.broadcast %248 : vector<1x10xf32> to vector<8x10xf32>
    %270 = arith.addf %268, %269 : vector<8x10xf32>
    %c0_80 = arith.constant 0 : index
    %c0_81 = arith.constant 0 : index
    %c0_82 = arith.constant 0 : index
    %271 = vector.load %arg6[%c0_80, %c0_81, %c0_82] : memref<1x8x10xf32, #tpu.memory_space<vmem>>, vector<1x8x10xf32>
    %272 = vector.shape_cast %271 : vector<1x8x10xf32> to vector<8x10xf32>
    %273 = vector.shape_cast %270 : vector<8x10xf32> to vector<1x8x10xf32>
    tpu.vector_store %arg6[%c0_80, %c0_81, %c0_82], %273 {strides = array<i32>} : memref<1x8x10xf32, #tpu.memory_space<vmem>>, vector<1x8x10xf32>,
    return
  }
  func.func @transform_0(%arg0: i32) -> (i32, i32, i32) {
    %c0_i32 = arith.constant 0 : i32
    %c0_i32_0 = arith.constant 0 : i32
    %c0_i32_1 = arith.constant 0 : i32
    return %arg0, %c0_i32, %c0_i32_0 : i32, i32, i32
  }
  func.func @transform_1(%arg0: i32) -> (i32, i32, i32) {
    %c0_i32 = arith.constant 0 : i32
    %c0_i32_0 = arith.constant 0 : i32
    %c0_i32_1 = arith.constant 0 : i32
    %c0_i32_2 = arith.constant 0 : i32
    return %c0_i32, %c0_i32_0, %c0_i32_1 : i32, i32, i32
  }
  func.func @transform_2(%arg0: i32) -> (i32, i32, i32) {
    %c0_i32 = arith.constant 0 : i32
    %c0_i32_0 = arith.constant 0 : i32
    %c0_i32_1 = arith.constant 0 : i32
    %c0_i32_2 = arith.constant 0 : i32
    return %c0_i32, %c0_i32_0, %c0_i32_1 : i32, i32, i32
  }
  func.func @transform_3(%arg0: i32) -> (i32, i32, i32) {
    %c0_i32 = arith.constant 0 : i32
    %c0_i32_0 = arith.constant 0 : i32
    %c0_i32_1 = arith.constant 0 : i32
    %c0_i32_2 = arith.constant 0 : i32
    return %c0_i32, %c0_i32_0, %c0_i32_1 : i32, i32, i32
  }
  func.func @transform_4(%arg0: i32) -> (i32, i32) {
    %c0_i32 = arith.constant 0 : i32
    %c0_i32_0 = arith.constant 0 : i32
    %c0_i32_1 = arith.constant 0 : i32
    return %c0_i32, %c0_i32_0 : i32, i32
  }
  func.func @transform_5(%arg0: i32) -> (i32, i32, i32) {
    %c0_i32 = arith.constant 0 : i32
    %c0_i32_0 = arith.constant 0 : i32
    %c0_i32_1 = arith.constant 0 : i32
    return %arg0, %c0_i32, %c0_i32_0 : i32, i32, i32
  }
}

</mosaic_0001>

<bundles_post_ra>
// kernel: tpu_custom_call.1
= control target key start
LH: loop header
LB: loop body
LE: loop exit
PB: predicated region body
PF: predicated region fallthrough
CT: control target
= control target key end

     0   :  { %10 = vsyncpa [#allocation3], 0  ;;  %s1514_s0 = inlined_call_operand.vmem [shape: f32[2,8,10], index: 0, kind: input, shape index: {}]   ;;  %s1515_s1 = inlined_call_operand.vmem [shape: f32[2,10,64], index: 1, kind: input, shape index: {}]   ;;  %s1516_s2 = inlined_call_operand.vmem [shape: f32[2,24,10], index: 2, kind: input, shape index: {}]   ;;  %s1517_s3 = inlined_call_operand.vmem [shape: f32[2,6,24], index: 3, kind: input, shape index: {}]   ;;  %s1518_s4 = inlined_call_operand.vmem [shape: f32[2,10], index: 4, kind: input, shape index: {}]   ;;  %s1519_s5 = inlined_call_operand.hbm [shape: f32[2,8,10], index: 5, kind: output, shape index: {}]  }
   0x1   :  { %12 = vsyncpa [#allocation3 + $0x1], 0  ;;  %s1251_s18 = smov 0   ;;  %s1253_s19 = smov 0  }
   0x2   :  { %s1255_s20 = smov 0   ;;  %s1257_s21 = smov 0  }
   0x3 LB: > { %s1272_s22 = sadd.s32 4294967295, %s1212_s21   ;;  %s1025_s23 = sadd.s32 4294967294, %s1212_s21   ;;  %s1212_s21 = sphi %s1257_s21, %s1525_s21   ;;  %s1208_s20 = sphi %s1255_s20, %s1524_s20   ;;  %s1204_s19 = sphi %s1253_s19, %s1523_s19   ;;  %s1200_s18 = sphi %s1251_s18, %s1522_s18  }
   0x4   : > { %s1276_s24 = sadd.s32 1, %s1212_s21   ;;  %s135_s25 = sadd.s32 1, %s1208_s20 }
   0x5   : > { %s132_s26 = ssub.s32 %s1212_s21, %s1276_s24  ;;  %p145_p0 = scmp.ne.s32.totalorder %s1208_s20, %s1204_s19 }
   0x6   : > { %p133_p1 = scmp.eq.s32.totalorder %s132_s26, 0  ;;  %p146_p2 = scmp.eq.s32.totalorder %s1272_s22, 1 }
   0x7   : > { %p151_p3 = scmp.ne.s32.totalorder %s1204_s19, %s1200_s18  ;;  %p152_p4 = scmp.eq.s32.totalorder %s1025_s23, 1 }
   0x8   : > { %s1287_s27 = scalar_select %p133_p1, %s1208_s20, %s135_s25  }
   0x9   : > { %p1289_p5 = por %p146_p2, %p145_p0  ;;  %p1293_p6 = por %p152_p4, %p151_p3 }
   0xa   : > { %p1028_p7 = scmp.ge.s32.totalorder %s1212_s21, 1  ;;  %p189_p8 = scmp.lt.s32.totalorder %s1212_s21, 3 }
   0xc   : > { %p190_p9 = pnand %p1028_p7, %p189_p8 }
   0xd   : > { %p216_p10 = scmp.lt.s32.totalorder (!%p190_p9), %s1272_s22, 1  ;;  %s1216_s14 = smov (!%p190_p9), 20  }
   0xe   : > { %193 = sbr.rel (%p190_p9) target bundleno = 3713 (0xe81), region = 40  ;;  %s1217_s17 = smov (!%p190_p9), 118  }
   0xf   : > { %s1218_s23 = smov (!%p190_p9), 108   ;;  %s1219_s25 = smov (!%p190_p9), 98  }
  0x10   : > { %s1220_s26 = smov (!%p190_p9), 88   ;;  %s213_s7 = sand.u32 (!%p190_p9), 1, %s1204_s19  }
  0x11   : > { %s1029_s8 = sshll.u32 (!%p190_p9), %s213_s7, 3 }
  0x13   : > { %s217_s30 = scalar_select %p216_p10, %s1272_s22, 1  ;;  %vm239_vm0 = vcmask 80896   ;;  %v1214_v2 = vmov 10.0   ;;  %v1316_v14 = vld [vmem:[%s1515_s1 + $0x8] sm:$0x3]  ;;  %vm276_vm2 = vcmask 1041408   ;;  %v221_v16 = vlaneseq }
  0x14   : > { %1122 = vrcp.f32 %v1214_v2  ;;  %v1321_v15 = vld [vmem:[%s1515_s1] sm:$0xff]  ;;  %1033 = vmatpush.msk.msra.mxu0 %vm276_vm2, %v1316_v14  ;;  %v1215_v19 = vmov 0.0   ;;  %vm330_vm10 = vcmask 64512  }
  0x15   : > { %s1030_s6 = sshll.u32 %s217_s30, 3  ;;  %v222_v17 = vand.u32 127, %v221_v16  ;;  %v1336_v26 = vld [vmem:[%s1517_s3] sm:$0x3f] }
  0x16   : > { %s219_s9 = scalar_lea.vmem %s1514_s0, %s1030_s6  ;;  %295 = vmatpush.msra.mxu0 %v1321_v15  ;;  %v257_v29 = vperm.slane %v1336_v26, 0  ;;  %v271_v33 = vperm.slane %v1336_v26, 1 }
  0x17   : > { %v1304_v0 = vld [vmem:[%s219_s9] sm:$0xff]  ;;  %vm224_vm3 = vcmp.lt.s32.totalorder %v222_v17, 5  ;;  %vm228_vm4 = vcmp.ge.s32.totalorder %v222_v17, 5  ;;  %vm229_vm5 = vcmp.lt.s32.totalorder %v222_v17, 10  ;;  %s1066_s9 = sshll.u32 %s1272_s22, 3  ;;  %s215_s22 = scalar_lea.vmem [#allocation2], %s1029_s8 }
  0x18   : > { %v240_v1 = vsel %vm239_vm0, %v1304_v0, 0.0  ;;  %v1326_v20 = vsel %vm224_vm3, 1.0, %v1215_v19  ;;  %vm230_vm6 = vmand %vm228_vm4, %vm229_vm5  ;;  %s1170_s8 = scalar_lea.hbm %s1519_s5, 16 }
  0x19   : > { %241 = vadd.xlane.f32.xlu0 %v240_v1  ;;  %v1329_v22 = vsel %vm230_vm6, 1.0, %v1215_v19 }
  0x1a   : > { %v1123_v3 = vpop.eup %1122 }
  0x1b   : > { %v244_v4 = vmul.f32 10.0, %v1123_v3  ;;  %vm248_vm1 = vweird.f32 %v1123_v3 }
  0x1d   : > { %v245_v5 = vsub.f32 1.0, %v244_v4 }
  0x1f   : > { %v246_v6 = vmul.f32 %v1123_v3, %v245_v5 }
  0x21   : > { %v247_v7 = vadd.f32 %v1123_v3, %v246_v6 }
  0x23   : > { %v1308_v8 = vsel %vm248_vm1, %v1123_v3, %v247_v7 }
  0x8c   : > { %v242_v9 = vpop.xlane.xlu0 %241 }
  0x8d   : > { %v250_v10 = vmul.f32 %v1308_v8, %v242_v9 }
  0x8f   : > { %v251_v11 = vsub.f32 %v1304_v0, %v250_v10 }
  0x91   : > { %v252_v12 = vmul.f32 %v251_v11, %v251_v11  ;;  %v258_v32 = vmul.f32 %v257_v29, %v251_v11 }
  0x93   : > { %v253_v13 = vsel %vm239_vm0, %v252_v12, 0.0 }
  0x94   : > { %254 = vadd.xlane.f32.xlu0 %v253_v13 }
  0xa8   : > { %356 = vrot.lane.b32.xlu0 %v1326_v20, %s1216_s14 }
 0x107   : > { %v255_v18 = vpop.xlane.xlu0 %254 }
 0x108   : > { %v256_v21 = vmul.f32 %v255_v18, %v1308_v8 }
 0x10a   : > { %v259_v23 = vadd.f32 1e-06, %v256_v21 }
 0x10c   : > { %1124 = vrsqrt.f32 %v259_v23  ;;  %vm266_vm8 = vweird.f32 %v259_v23 }
 0x112   : > { %v1125_v24 = vpop.eup %1124 }
 0x113   : > { %v261_v25 = vmul.f32 %v1125_v24, %v259_v23  ;;  %vm267_vm7 = vweird.f32 %v1125_v24 }
 0x114   : > { %vm268_vm9 = vmor %vm266_vm8, %vm267_vm7  ;;  %vm558_vm8 = vcmask 195584  }
 0x115   : > { %v262_v27 = vmul.f32 %v1125_v24, %v261_v25 }
 0x117   : > { %v263_v28 = vmul.f32 0.5, %v262_v27 }
 0x119   : > { %v264_v30 = vsub.f32 1.5, %v263_v28 }
 0x11a   : > { %v1362_v59 = vpop.permute.xlu0 %356 }
 0x11b   : > { %v265_v31 = vmul.f32 %v1125_v24, %v264_v30 }
 0x11d   : > { %v269_v34 = vsel %vm268_vm9, %v1125_v24, %v265_v31 }
 0x11e   : > { %v270_v35 = vmul.f32 %v269_v34, %v258_v32 }
 0x120   : > { %v272_v36 = vadd.f32 %v271_v33, %v270_v35 }
 0x122   : > { %1034 = vmatmul.msk.f32.vlgmr.msra.gmra.mxu0 %vm239_vm0, %v272_v36 }
 0x19f   : > { %v297_v37 = vpop.f32.mrf.mxu0 }
 0x1a0   : > { %302 = vrot.lane.b32.xlu1 %v297_v37, %s1217_s17  ;;  %v300_v39 = vmul.f32 %v1326_v20, %v297_v37  ;;  %v360_v40 = vmul.f32 %v1329_v22, %v297_v37  ;;  %v359_v60 = vmul.f32 %v1362_v59, %v297_v37 }
 0x212   : > { %v303_v38 = vpop.permute.xlu1 %302 }
 0x213   : > { %1035 = vmatpush.xpose.msk.msra.mxu1 %vm239_vm0, %v303_v38  ;;  %1037 = vmatpush.xpose.msk.msra.mxu2 %vm239_vm0, %v303_v38 }
 0x216   : > { %1036 = vmatmul.msk.f32.vlgmr.msra.gmra.mxu1 %vm239_vm0, %v300_v39  ;;  %1038 = vmatmul.msk.f32.vlgmr.msra.gmra.mxu2 %vm239_vm0, %v360_v40 }
 0x293   : > { %v326_v41 = vpop.f32.mrf.mxu1 }
 0x294   : > { %v329_v42 = vmul.f32 0.4472136, %v326_v41 }
 0x296   : > { %v331_v43 = vsel %vm330_vm10, %v329_v42, -inf }
 0x297   : > { %332 = vmax.xlane.f32.xlu2 %v331_v43 }
 0x299   : > { %v381_v44 = vpop.f32.mrf.mxu2 }
 0x29a   : > { %v384_v45 = vmul.f32 0.4472136, %v381_v44 }
 0x29c   : > { %v385_v46 = vsel %vm330_vm10, %v384_v45, -inf }
 0x29d   : > { %386 = vmax.xlane.f32.xlu1 %v385_v46 }
 0x2af   : > { %410 = vrot.lane.b32.xlu2 %v1329_v22, %s1216_s14  ;;  %s961_s14 = scalar_lea.hbm %s1519_s5, %s1066_s9 }
 0x30a   : > { %v333_v47 = vpop.xlane.xlu2 %332 }
 0x30b   : > { %v334_v48 = vsub.f32 %v329_v42, %v333_v47 }
 0x30d   : > { %v335_v49 = vmul.f32 1.442695, %v334_v48 }
 0x30f   : > { %1126 = vpow2.f32 %v335_v49  ;;  %v510_v49 = vperm.slane %v1336_v26, 2 }
 0x310   : > { %v387_v50 = vpop.xlane.xlu1 %386 }
 0x311   : > { %v388_v51 = vsub.f32 %v384_v45, %v387_v50 }
 0x312   : > { %v1352_v52 = vpop.permute.xlu2 %410 }
 0x313   : > { %v389_v53 = vmul.f32 1.442695, %v388_v51  ;;  %v413_v54 = vmul.f32 %v1352_v52, %v297_v37 }
 0x315   : > { %v1127_v55 = vpop.eup %1126  ;;  %1128 = vpow2.f32 %v389_v53  ;;  %415 = vrot.lane.b32.xlu1 %v413_v54, %s1218_s23  ;;  %v524_v54 = vperm.slane %v1336_v26, 3 }
 0x316   : > { %v337_v56 = vsel %vm330_vm10, %v1127_v55, 0.0 }
 0x317   : > { %338 = vadd.xlane.f32.xlu0 %v337_v56 }
 0x31b   : > { %v1129_v57 = vpop.eup %1128 }
 0x31c   : > { %v391_v58 = vsel %vm330_vm10, %v1129_v57, 0.0 }
 0x31d   : > { %392 = vadd.xlane.f32.xlu2 %v391_v58  ;;  %471 = vrot.lane.b32.xlu1 %v1316_v14, %s1219_s25  ;;  %v237_v58 = vld [vmem:[%s1516_s2 + $0x10] sm:$0xff] }
 0x31e   : > { %575 = vmatpush.msrb.mxu2 %v237_v58 }
 0x32b   : > { %469 = vrot.lane.b32.xlu0 %v1321_v15, %s1219_s25 }
 0x333   : > { %529 = vrot.lane.b32.xlu0 %v1316_v14, %s1220_s26 }
 0x335   : > { %442 = vrot.lane.b32.xlu2 %v359_v60, %s1218_s23  ;;  %v236_v60 = vld [vmem:[%s1516_s2 + $0x8] sm:$0xff] }
 0x336   : > { %576 = vmatpush.msrb.mxu2 %v236_v60 }
 0x33b   : > { %527 = vrot.lane.b32.xlu0 %v1321_v15, %s1220_s26 }
 0x387   : > { %v416_v61 = vpop.permute.xlu1 %415 }
 0x388   : > { %436 = vmatpush.msra.mxu3 %v416_v61  ;;  %v235_v61 = vld [vmem:[%s1516_s2] sm:$0xff] }
 0x389   : > { %577 = vmatpush.msrb.mxu2 %v235_v61 }
 0x38a   : > { %v339_v62 = vpop.xlane.xlu0 %338 }
 0x38b   : > { %1130 = vrcp.f32 %v339_v62  ;;  %v351_v19 = vand.u32 2147483648, %v339_v62  ;;  %vm345_vm1 = vweird.f32 %v339_v62  ;;  %v349_v23 = vand.u32 2147483647, %v339_v62 }
 0x38d   : > { %v352_v27 = vor.u32 1.1754944e-38, %v351_v19  ;;  %vm350_vm4 = vcmp.eq.f32.partialorder %v349_v23, 8.507059e+37 }
 0x38f   : > { %v472_v30 = vpop.permute.xlu1 %471 }
 0x390   : > { %v393_v63 = vpop.xlane.xlu2 %392  ;;  %1041 = vmatpush.msk.msrb.mxu0 %vm276_vm2, %v472_v30 }
 0x391   : > { %v1131_v1 = vpop.eup %1130  ;;  %1132 = vrcp.f32 %v393_v63  ;;  %v405_v9 = vand.u32 2147483648, %v393_v63  ;;  %v403_v12 = vand.u32 2147483647, %v393_v63  ;;  %vm399_vm12 = vweird.f32 %v393_v63 }
 0x392   : > { %v341_v2 = vmul.f32 %v1131_v1, %v339_v62  ;;  %vm346_vm14 = vweird.f32 %v1131_v1  ;;  %v526_v62 = vperm.slane %v1336_v26, 5 }
 0x393   : > { %v406_v16 = vor.u32 1.1754944e-38, %v405_v9  ;;  %vm404_vm15 = vcmp.eq.f32.partialorder %v403_v12, 8.507059e+37  ;;  %vm347_vm3 = vmor %vm345_vm1, %vm346_vm14 }
 0x394   : > { %v342_v4 = vsub.f32 1.0, %v341_v2 }
 0x396   : > { %v343_v10 = vmul.f32 %v1131_v1, %v342_v4 }
 0x397   : > { %v1133_v3 = vpop.eup %1132 }
 0x398   : > { %v395_v5 = vmul.f32 %v1133_v3, %v393_v63  ;;  %v443_v6 = vpop.permute.xlu2 %442  ;;  %vm400_vm11 = vweird.f32 %v1133_v3  ;;  %v344_v17 = vadd.f32 %v1131_v1, %v343_v10 }
 0x399   : > { %463 = vmatpush.msrb.mxu3 %v443_v6  ;;  %vm401_vm13 = vmor %vm399_vm12, %vm400_vm11 }
 0x39a   : > { %v396_v7 = vsub.f32 1.0, %v395_v5  ;;  %v348_v25 = vsel %vm347_vm3, %v1131_v1, %v344_v17 }
 0x39b   : > { %v353_v28 = vsel %vm350_vm4, %v352_v27, %v348_v25 }
 0x39c   : > { %v397_v11 = vmul.f32 %v1133_v3, %v396_v7  ;;  %v354_v29 = vmul.f32 %v1127_v55, %v353_v28 }
 0x39d   : > { %v470_v31 = vpop.permute.xlu0 %469 }
 0x39e   : > { %v398_v13 = vadd.f32 %v1133_v3, %v397_v11  ;;  %494 = vmatpush.msrb.mxu0 %v470_v31 }
 0x3a0   : > { %v402_v18 = vsel %vm401_vm13, %v1133_v3, %v398_v13  ;;  %v583_v3 = vperm.slane %v1336_v26, 4  ;;  %v1405_v26 = vld [vmem:[%s1515_s1 + $0x18] sm:$0x3] }
 0x3a1   : > { %v407_v21 = vsel %vm404_vm15, %v406_v16, %v402_v18  ;;  %v1412_v16 = vld [vmem:[%s1515_s1 + $0x10] sm:$0xff] }
 0x3a2   : > { %v408_v24 = vmul.f32 %v1129_v57, %v407_v21 }
 0x3a4   : > { %1039 = vmatmul.msk.f32.vlgmr.msra.gmra.mxu3 %vm330_vm10, %v408_v24  ;;  %v1419_v24 = vld [vmem:[%s1517_s3 + $0x8] sm:$0x3f] }
 0x3a5   : > { %v530_v43 = vpop.permute.xlu0 %529  ;;  %1052 = vmatpush.msk.msra.mxu3 %vm276_vm2, %v1405_v26  ;;  %v604_v28 = vperm.slane %v1419_v24, 0 }
 0x3a6   : > { %1043 = vmatpush.msk.msrb.mxu1 %vm276_vm2, %v530_v43 }
 0x3a7   : > { %641 = vmatpush.msra.mxu3 %v1412_v16 }
 0x3ac   : > { %1040 = vmatmul.msk.f32.vlgmr.msrb.gmra.mxu3 %vm330_vm10, %v354_v29 }
 0x3ad   : > { %v528_v14 = vpop.permute.xlu0 %527 }
 0x3ae   : > { %552 = vmatpush.msrb.mxu1 %v528_v14 }
 0x427   : > { %v438_v32 = vpop.f32.mrf.mxu3 }
 0x42f   : > { %v465_v33 = vpop.f32.mrf.mxu3 }
 0x430   : > { %v466_v34 = vadd.f32 %v465_v33, %v438_v32  ;;  %v618_v32 = vperm.slane %v1419_v24, 1 }
 0x432   : > { %1042 = vmatmul.msk.f32.vlgmr.msrb.gmra.mxu0 %vm239_vm0, %v466_v34 }
 0x4af   : > { %v496_v35 = vpop.f32.mrf.mxu0 }
 0x4b0   : > { %v499_v36 = vadd.f32 %v496_v35, %v1304_v0 }
 0x4b2   : > { %v500_v37 = vsel %vm239_vm0, %v499_v36, 0.0 }
 0x4b3   : > { %501 = vadd.xlane.f32.xlu1 %v500_v37 }
 0x526   : > { %v502_v38 = vpop.xlane.xlu1 %501 }
 0x527   : > { %v503_v39 = vmul.f32 %v502_v38, %v1308_v8 }
 0x529   : > { %v504_v40 = vsub.f32 %v499_v36, %v503_v39 }
 0x52b   : > { %v505_v41 = vmul.f32 %v504_v40, %v504_v40  ;;  %v511_v53 = vmul.f32 %v510_v49, %v504_v40 }
 0x52d   : > { %v506_v42 = vsel %vm239_vm0, %v505_v41, 0.0 }
 0x52e   : > { %507 = vadd.xlane.f32.xlu2 %v506_v42 }
 0x5a1   : > { %v508_v0 = vpop.xlane.xlu2 %507 }
 0x5a2   : > { %v509_v44 = vmul.f32 %v508_v0, %v1308_v8 }
 0x5a4   : > { %v512_v45 = vadd.f32 1e-06, %v509_v44 }
 0x5a6   : > { %1134 = vrsqrt.f32 %v512_v45  ;;  %vm519_vm6 = vweird.f32 %v512_v45 }
 0x5ac   : > { %v1135_v46 = vpop.eup %1134 }
 0x5ad   : > { %v514_v15 = vmul.f32 %v1135_v46, %v512_v45  ;;  %vm520_vm5 = vweird.f32 %v1135_v46 }
 0x5ae   : > { %vm521_vm7 = vmor %vm519_vm6, %vm520_vm5 }
 0x5af   : > { %v515_v47 = vmul.f32 %v1135_v46, %v514_v15 }
 0x5b1   : > { %v516_v48 = vmul.f32 0.5, %v515_v47 }
 0x5b3   : > { %v517_v50 = vsub.f32 1.5, %v516_v48 }
 0x5b5   : > { %v518_v51 = vmul.f32 %v1135_v46, %v517_v50 }
 0x5b7   : > { %v522_v55 = vsel %vm521_vm7, %v1135_v46, %v518_v51 }
 0x5b8   : > { %v523_v56 = vmul.f32 %v522_v55, %v511_v53 }
 0x5ba   : > { %v525_v57 = vadd.f32 %v524_v54, %v523_v56 }
 0x5bc   : > { %1044 = vmatmul.msk.f32.vlgmr.msrb.gmra.mxu1 %vm239_vm0, %v525_v57 }
 0x639   : > { %v554_v63 = vpop.f32.mrf.mxu1 }
 0x63a   : > { %v555_v1 = vadd.f32 %v554_v63, %v526_v62 }
 0x63c   : > { %v557_v2 = vmax.f32 %v555_v1, 0.0 }
 0x63e   : > { %1045 = vmatmul.msk.f32.vlgmr.msrb.gmra.mxu2 %vm558_vm8, %v557_v2 }
 0x6c1   : > { %v579_v4 = vpop.f32.mrf.mxu2 }
 0x6c2   : > { %v582_v5 = vadd.f32 %v579_v4, %v499_v36 }
 0x6c4   : > { %v1395_v6 = vadd.f32 %v583_v3, %v582_v5 }
 0x6c6   : > { %v594_v7 = vsel %vm239_vm0, %v1395_v6, 0.0 }
 0x6c7   : > { %595 = vadd.xlane.f32.xlu0 %v594_v7 }
 0x73a   : > { %v596_v9 = vpop.xlane.xlu0 %595 }
 0x73b   : > { %v597_v10 = vmul.f32 %v596_v9, %v1308_v8 }
 0x73d   : > { %v598_v11 = vsub.f32 %v1395_v6, %v597_v10 }
 0x73f   : > { %v599_v12 = vmul.f32 %v598_v11, %v598_v11  ;;  %v605_v31 = vmul.f32 %v604_v28, %v598_v11 }
 0x741   : > { %v600_v13 = vsel %vm239_vm0, %v599_v12, 0.0 }
 0x742   : > { %601 = vadd.xlane.f32.xlu1 %v600_v13 }
 0x7b5   : > { %v602_v17 = vpop.xlane.xlu1 %601 }
 0x7b6   : > { %v603_v18 = vmul.f32 %v602_v17, %v1308_v8 }
 0x7b8   : > { %v606_v19 = vadd.f32 1e-06, %v603_v18 }
 0x7ba   : > { %1136 = vrsqrt.f32 %v606_v19  ;;  %vm613_vm11 = vweird.f32 %v606_v19 }
 0x7c0   : > { %v1137_v21 = vpop.eup %1136 }
 0x7c1   : > { %v608_v23 = vmul.f32 %v1137_v21, %v606_v19  ;;  %vm614_vm9 = vweird.f32 %v1137_v21 }
 0x7c2   : > { %vm615_vm12 = vmor %vm613_vm11, %vm614_vm9 }
 0x7c3   : > { %v609_v25 = vmul.f32 %v1137_v21, %v608_v23 }
 0x7c5   : > { %v610_v27 = vmul.f32 0.5, %v609_v25 }
 0x7c7   : > { %v611_v29 = vsub.f32 1.5, %v610_v27 }
 0x7c9   : > { %v612_v30 = vmul.f32 %v1137_v21, %v611_v29 }
 0x7cb   : > { %v616_v33 = vsel %vm615_vm12, %v1137_v21, %v612_v30 }
 0x7cc   : > { %v617_v34 = vmul.f32 %v616_v33, %v605_v31 }
 0x7ce   : > { %v619_v35 = vadd.f32 %v618_v32, %v617_v34 }
 0x7d0   : > { %1053 = vmatmul.msk.f32.vlgmr.msra.gmra.mxu3 %vm239_vm0, %v619_v35 }
 0x853   : > { %v643_v36 = vpop.f32.mrf.mxu3 }
 0x854   : > { %648 = vrot.lane.b32.xlu1 %v643_v36, %s1217_s17  ;;  %v700_v37 = vmul.f32 %v643_v36, %v1362_v59  ;;  %v750_v38 = vmul.f32 %v643_v36, %v1352_v52  ;;  %v646_v41 = vmul.f32 %v1326_v20, %v643_v36  ;;  %v701_v42 = vmul.f32 %v1329_v22, %v643_v36  ;;  %s963_s17 = sshll.u32 %s215_s22, 4  ;;  %s964_s17 = int_to_ptr.vmem [resolvable:$true] %s963_s17 }
 0x856   : > { %v1115_v39 = vpack.i.bf16 %v700_v37, %v750_v38 }
 0x85c   : > { %1116 = vrot.lane.b32.xlu1 %v1115_v39, %s1218_s23  ;;  %s965_s23 = sshll.u32 %s961_s14, 4  ;;  %s966_s23 = int_to_ptr.hbm [resolvable:$true] %s965_s23 }
 0x8c6   : > { %v649_v40 = vpop.permute.xlu1 %648 }
 0x8c7   : > { %1054 = vmatpush.xpose.msk.msra.mxu0 %vm239_vm0, %v649_v40  ;;  %1056 = vmatpush.xpose.msk.msra.mxu1 %vm239_vm0, %v649_v40 }
 0x8ca   : > { %1055 = vmatmul.msk.f32.vlgmr.msra.gmra.mxu0 %vm239_vm0, %v646_v41  ;;  %1057 = vmatmul.msk.f32.vlgmr.msra.gmra.mxu1 %vm239_vm0, %v701_v42 }
 0x8ce   : > { %v1117_v43 = vpop.permute.xlu1 %1116 }
 0x8cf   : > { %v1119_v59 = vunpack.i.h.bf16 %v1117_v43  ;;  %v1118_v14 = vunpack.i.l.bf16 %v1117_v43 }
 0x8d1   : > { %773 = vmatpush.msra.mxu2 %v1118_v14  ;;  %800 = vmatpush.msrb.mxu3 %v1119_v59 }
 0x947   : > { %v672_v52 = vpop.f32.mrf.mxu0  ;;  %v722_v45 = vpop.f32.mrf.mxu1 }
 0x948   : > { %v675_v0 = vmul.f32 0.4472136, %v672_v52  ;;  %v725_v46 = vmul.f32 0.4472136, %v722_v45  ;;  %v847_v52 = vperm.slane %v1419_v24, 2 }
 0x94a   : > { %v676_v44 = vsel %vm330_vm10, %v675_v0, -inf  ;;  %v726_v20 = vsel %vm330_vm10, %v725_v46, -inf }
 0x94b   : > { %677 = vmax.xlane.f32.xlu2 %v676_v44 }
 0x953   : > { %727 = vmax.xlane.f32.xlu2 %v726_v20 }
 0x9be   : > { %v678_v22 = vpop.xlane.xlu2 %677 }
 0x9bf   : > { %v679_v15 = vsub.f32 %v675_v0, %v678_v22 }
 0x9c1   : > { %v680_v47 = vmul.f32 1.442695, %v679_v15 }
 0x9c3   : > { %1138 = vpow2.f32 %v680_v47  ;;  %v1050_v47 = vld [vmem:[%s1516_s2 + $0x28] sm:$0xff] }
 0x9c4   : > { %911 = vmatpush.msrb.mxu2 %v1050_v47 }
 0x9c6   : > { %v728_v48 = vpop.xlane.xlu2 %727 }
 0x9c7   : > { %v729_v49 = vsub.f32 %v725_v46, %v728_v48  ;;  %v861_v46 = vperm.slane %v1419_v24, 3  ;;  %v1049_v48 = vld [vmem:[%s1516_s2 + $0x20] sm:$0xff] }
 0x9c8   : > { %912 = vmatpush.msrb.mxu2 %v1049_v48 }
 0x9c9   : > { %v1139_v50 = vpop.eup %1138  ;;  %v730_v51 = vmul.f32 1.442695, %v729_v49  ;;  %v1048_v49 = vld [vmem:[%s1516_s2 + $0x18] sm:$0xff] }
 0x9ca   : > { %v682_v53 = vsel %vm330_vm10, %v1139_v50, 0.0  ;;  %913 = vmatpush.msrb.mxu2 %v1048_v49 }
 0x9cb   : > { %1140 = vpow2.f32 %v730_v51  ;;  %683 = vadd.xlane.f32.xlu2 %v682_v53 }
 0x9d1   : > { %v1141_v54 = vpop.eup %1140 }
 0x9d2   : > { %v732_v55 = vsel %vm330_vm10, %v1141_v54, 0.0 }
 0x9d3   : > { %733 = vadd.xlane.f32.xlu0 %v732_v55  ;;  %v919_v55 = vperm.slane %v1419_v24, 4 }
 0x9e3   : > { %808 = vrot.lane.b32.xlu2 %v1405_v26, %s1219_s25 }
 0x9e7   : > { %806 = vrot.lane.b32.xlu0 %v1412_v16, %s1219_s25  ;;  %s951_s25 = scalar_lea.sflag [#allocation3], %s213_s7 }
 0x9eb   : > { %866 = vrot.lane.b32.xlu2 %v1405_v26, %s1220_s26 }
 0x9f3   : > { %864 = vrot.lane.b32.xlu2 %v1412_v16, %s1220_s26  ;;  %s1164_s26 = sshra.s32 %s966_s23, 4  ;;  %s1165_s26 = int_to_ptr.hbm [resolvable:$true] %s1164_s26 }
 0x9f4   : > { %s1166_s30 = scalar_lea.hbm %s1165_s26, 8  ;;  %p1171_p0 = scmp.lt.s32.totalorder %s1165_s26, %s1519_s5 }
 0x9f5   : > { %p1167_p11 = scmp.ne.s32.totalorder %s1165_s26, %s1166_s30  ;;  %p1172_p1 = scmp.lt.s32.totalorder %s1170_s8, %s1166_s30 }
 0x9f7   : > { %p1168_p12 = pnand %p1167_p11, %p1289_p5  ;;  %p1173_p2 = por %p1172_p1, %p1171_p0 }
 0x9f9   : > { %p1169_p13 = pneg %p1168_p12 }
 0x9fb   : > { %p1174_p3 = pnand %p1173_p2, %p1169_p13 }
 0xa3e   : > { %v684_v56 = vpop.xlane.xlu2 %683 }
 0xa3f   : > { %1142 = vrcp.f32 %v684_v56  ;;  %v696_v62 = vand.u32 2147483648, %v684_v56  ;;  %v694_v1 = vand.u32 2147483647, %v684_v56  ;;  %vm690_vm14 = vweird.f32 %v684_v56 }
 0xa41   : > { %v697_v4 = vor.u32 1.1754944e-38, %v696_v62  ;;  %vm695_vm1 = vcmp.eq.f32.partialorder %v694_v1, 8.507059e+37 }
 0xa45   : > { %v1143_v57 = vpop.eup %1142 }
 0xa46   : > { %v686_v58 = vmul.f32 %v1143_v57, %v684_v56  ;;  %v734_v60 = vpop.xlane.xlu0 %733  ;;  %vm691_vm13 = vweird.f32 %v1143_v57  ;;  %v809_v23 = vpop.permute.xlu2 %808 }
 0xa47   : > { %1144 = vrcp.f32 %v734_v60  ;;  %vm692_vm15 = vmor %vm690_vm14, %vm691_vm13  ;;  %v746_v12 = vand.u32 2147483648, %v734_v60  ;;  %v744_v26 = vand.u32 2147483647, %v734_v60  ;;  %vm740_vm4 = vweird.f32 %v734_v60  ;;  %1060 = vmatpush.msk.msrb.mxu0 %vm276_vm2, %v809_v23 }
 0xa48   : > { %v687_v61 = vsub.f32 1.0, %v686_v58 }
 0xa49   : > { %v747_v17 = vor.u32 1.1754944e-38, %v746_v12  ;;  %vm745_vm6 = vcmp.eq.f32.partialorder %v744_v26, 8.507059e+37  ;;  %v1121_v26 = vld [vmem:[%s1518_s4 + $0x1] ss:$0 sm:$0xff] }
 0xa4a   : > { %v688_v63 = vmul.f32 %v1143_v57, %v687_v61 }
 0xa4c   : > { %v689_v2 = vadd.f32 %v1143_v57, %v688_v63 }
 0xa4d   : > { %v1145_v3 = vpop.eup %1144 }
 0xa4e   : > { %v693_v5 = vsel %vm692_vm15, %v1143_v57, %v689_v2  ;;  %v736_v7 = vmul.f32 %v1145_v3, %v734_v60  ;;  %vm741_vm3 = vweird.f32 %v1145_v3  ;;  %v867_v38 = vpop.permute.xlu2 %866 }
 0xa4f   : > { %v698_v9 = vsel %vm695_vm1, %v697_v4, %v693_v5  ;;  %vm742_vm5 = vmor %vm740_vm4, %vm741_vm3  ;;  %1062 = vmatpush.msk.msrb.mxu1 %vm276_vm2, %v867_v38 }
 0xa50   : > { %v737_v10 = vsub.f32 1.0, %v736_v7  ;;  %v699_v11 = vmul.f32 %v1139_v50, %v698_v9  ;;  %v863_v50 = vperm.slane %v1419_v24, 5 }
 0xa52   : > { %v738_v13 = vmul.f32 %v1145_v3, %v737_v10  ;;  %1059 = vmatmul.msk.f32.vlgmr.msrb.gmra.mxu3 %vm330_vm10, %v699_v11  ;;  %v1120_v11 = vld [vmem:[%s1518_s4] ss:$0 sm:$0xff] }
 0xa54   : > { %v739_v16 = vadd.f32 %v1145_v3, %v738_v13 }
 0xa56   : > { %v743_v18 = vsel %vm742_vm5, %v1145_v3, %v739_v16  ;;  %v865_v39 = vpop.permute.xlu2 %864 }
 0xa57   : > { %v748_v19 = vsel %vm745_vm6, %v747_v17, %v743_v18  ;;  %889 = vmatpush.msrb.mxu1 %v865_v39 }
 0xa58   : > { %v749_v21 = vmul.f32 %v1141_v54, %v748_v19 }
 0xa59   : > { %v807_v25 = vpop.permute.xlu0 %806 }
 0xa5a   : > { %1058 = vmatmul.msk.f32.vlgmr.msra.gmra.mxu2 %vm330_vm10, %v749_v21  ;;  %831 = vmatpush.msrb.mxu0 %v807_v25 }
 0xad5   : > { %v802_v27 = vpop.f32.mrf.mxu3 }
 0xadd   : > { %v775_v28 = vpop.f32.mrf.mxu2 }
 0xade   : > { %v803_v29 = vadd.f32 %v802_v27, %v775_v28 }
 0xae0   : > { %1061 = vmatmul.msk.f32.vlgmr.msrb.gmra.mxu0 %vm239_vm0, %v803_v29 }
 0xb5d   : > { %v833_v30 = vpop.f32.mrf.mxu0 }
 0xb5e   : > { %v836_v31 = vadd.f32 %v833_v30, %v1395_v6 }
 0xb60   : > { %v837_v32 = vsel %vm239_vm0, %v836_v31, 0.0 }
 0xb61   : > { %838 = vadd.xlane.f32.xlu1 %v837_v32 }
 0xbd4   : > { %v839_v33 = vpop.xlane.xlu1 %838 }
 0xbd5   : > { %v840_v34 = vmul.f32 %v839_v33, %v1308_v8 }
 0xbd7   : > { %v841_v35 = vsub.f32 %v836_v31, %v840_v34 }
 0xbd9   : > { %v842_v36 = vmul.f32 %v841_v35, %v841_v35  ;;  %v848_v45 = vmul.f32 %v847_v52, %v841_v35 }
 0xbdb   : > { %v843_v37 = vsel %vm239_vm0, %v842_v36, 0.0 }
 0xbdc   : > { %844 = vadd.xlane.f32.xlu0 %v843_v37 }
 0xc4f   : > { %v845_v40 = vpop.xlane.xlu0 %844 }
 0xc50   : > { %v846_v41 = vmul.f32 %v845_v40, %v1308_v8 }
 0xc52   : > { %v849_v6 = vadd.f32 1e-06, %v846_v41 }
 0xc54   : > { %1146 = vrsqrt.f32 %v849_v6  ;;  %vm856_vm7 = vweird.f32 %v849_v6 }
 0xc5a   : > { %v1147_v42 = vpop.eup %1146 }
 0xc5b   : > { %v851_v43 = vmul.f32 %v1147_v42, %v849_v6  ;;  %vm857_vm10 = vweird.f32 %v1147_v42 }
 0xc5c   : > { %vm858_vm2 = vmor %vm856_vm7, %vm857_vm10 }
 0xc5d   : > { %v852_v59 = vmul.f32 %v1147_v42, %v851_v43 }
 0xc5f   : > { %v853_v14 = vmul.f32 0.5, %v852_v59 }
 0xc61   : > { %v854_v0 = vsub.f32 1.5, %v853_v14 }
 0xc63   : > { %v855_v44 = vmul.f32 %v1147_v42, %v854_v0 }
 0xc65   : > { %v859_v20 = vsel %vm858_vm2, %v1147_v42, %v855_v44 }
 0xc66   : > { %v860_v22 = vmul.f32 %v859_v20, %v848_v45 }
 0xc68   : > { %v862_v15 = vadd.f32 %v861_v46, %v860_v22 }
 0xc6a   : > { %1063 = vmatmul.msk.f32.vlgmr.msrb.gmra.mxu1 %vm239_vm0, %v862_v15 }
 0xce7   : > { %v891_v51 = vpop.f32.mrf.mxu1 }
 0xce8   : > { %v892_v53 = vadd.f32 %v891_v51, %v863_v50 }
 0xcea   : > { %v894_v54 = vmax.f32 %v892_v53, 0.0 }
 0xcec   : > { %1064 = vmatmul.msk.f32.vlgmr.msrb.gmra.mxu2 %vm558_vm8, %v894_v54 }
 0xd6f   : > { %v915_v56 = vpop.f32.mrf.mxu2 }
 0xd70   : > { %v918_v57 = vadd.f32 %v915_v56, %v836_v31 }
 0xd72   : > { %v920_v58 = vadd.f32 %v919_v55, %v918_v57 }
 0xd74   : > { %v923_v60 = vsel %vm239_vm0, %v920_v58, 0.0 }
 0xd75   : > { %924 = vadd.xlane.f32.xlu2 %v923_v60 }
 0xde8   : > { %v925_v61 = vpop.xlane.xlu2 %924 }
 0xde9   : > { %v926_v62 = vmul.f32 %v925_v61, %v1308_v8 }
 0xdeb   : > { %v927_v63 = vsub.f32 %v920_v58, %v926_v62 }
 0xded   : > { %v928_v1 = vmul.f32 %v927_v63, %v927_v63  ;;  %v934_v13 = vmul.f32 %v1120_v11, %v927_v63 }
 0xdef   : > { %v929_v2 = vsel %vm239_vm0, %v928_v1, 0.0 }
 0xdf0   : > { %930 = vadd.xlane.f32.xlu1 %v929_v2 }
 0xe63   : > { %v931_v3 = vpop.xlane.xlu1 %930 }
 0xe64   : > { %v932_v4 = vmul.f32 %v931_v3, %v1308_v8 }
 0xe66   : > { %v935_v24 = vadd.f32 1e-06, %v932_v4 }
 0xe68   : > { %1148 = vrsqrt.f32 %v935_v24  ;;  %vm942_vm9 = vweird.f32 %v935_v24 }
 0xe6e   : > { %v1149_v5 = vpop.eup %1148 }
 0xe6f   : > { %v937_v7 = vmul.f32 %v1149_v5, %v935_v24  ;;  %vm943_vm8 = vweird.f32 %v1149_v5 }
 0xe70   : > { %vm944_vm11 = vmor %vm942_vm9, %vm943_vm8 }
 0xe71   : > { %v938_v9 = vmul.f32 %v1149_v5, %v937_v7 }
 0xe73   : > { %v939_v10 = vmul.f32 0.5, %v938_v9 }
 0xe75   : > { %v940_v12 = vsub.f32 1.5, %v939_v10 }
 0xe77   : > { %v941_v8 = vmul.f32 %v1149_v5, %v940_v12 }
 0xe79   : > { %v945_v16 = vsel %vm944_vm11, %v1149_v5, %v941_v8 }
 0xe7a   : > { %v946_v17 = vmul.f32 %v945_v16, %v934_v13 }
 0xe7c   : > { %v948_v18 = vadd.f32 %v1121_v26, %v946_v17 }
 0xe7e   : > { %949 = vst.msk [vmem:[%s215_s22] sm:$0xff] %vm239_vm0, %v948_v18 }
 0xe7f   : > { %1177 = shalt.err (!%p1174_p3)
}
 0xe80   : > { %1069 = dma.vmem_to_hbm [thread:$0]  (%p1289_p5), %s964_s17, 128, %s966_s23, %s951_s25  }
 0xe81 PF: > { %p1075_p4 = scmp.ge.s32.totalorder %s1212_s21, 2  ;;  %s977_s7 = sand.u32 1, %s1200_s18  }
 0xe82   : > { %s978_s12 = scalar_lea.sflag [#allocation3], %s977_s7 }
 0xe83   : > { %p1072_p7 = pnand %p1075_p4, %p1293_p6 }
 0xe85   : > { %p1073_p8 = pneg %p1072_p7 }
 0xe87   : > { %1195 = dma.done.wait (%p1073_p8), %s978_s12, 128  }
 0xe88   : > { %1197 = vsyncadd (%p1073_p8), %s978_s12, 4294967168  ;;  %p15_p9 = scmp.ge.s32.totalorder %s1276_s24, 4   ;;  %s1522_s18 = smov %s1204_s19 }
 0xe89   : > { %s1523_s19 = smov %s1208_s20  ;;  %s1524_s20 = smov %s1287_s27 }
 0xe8a   : > { %s1525_s21 = smov %s1276_s24  ;;  %17 = sbr.rel (!%p15_p9) target bundleno = 3 (0x3), region = 78 }
 0xe8f   :  { %984 = vsyncpa [#allocation3], 1 }
 0xe90   :  { %986 = vsyncpa [#allocation3 + $0x1], 1 }

</bundles_post_ra>
